<compile_context>
chip_gen: v5e
topology: v5e:2x2
jax: 0.10.0
libtpu: 0.0.40
codegen_flags: <defaults>
</compile_context>

<pallas_src>
import functools

import jax
import jax.numpy as jnp
from jax import lax
from jax.experimental import pallas as pl
from jax.experimental.pallas import tpu as pltpu

BN_EPS = 1e-5


# --------------------------------------------------------------------------
# TDNN layer: context-dilated unfold + Linear + ReLU + eval-BatchNorm, fused.
# Grid over utterances; weights / bias / BN stats stay resident in VMEM.
# --------------------------------------------------------------------------
def _tdnn_kernel(x_ref, w_ref, b_ref, mean_ref, var_ref, o_ref, *,
                 context, dilation, t_out, d_in):
    x = x_ref[0]                                            # (T_in, D_in)
    # sum over context offsets: y[t] = sum_i x[t + i*dil] @ W_i
    acc = jnp.dot(x[0:t_out, :], w_ref[0:d_in, :],
                  preferred_element_type=jnp.float32)
    for i in range(1, context):
        xi = x[i * dilation: i * dilation + t_out, :]
        wi = w_ref[i * d_in: (i + 1) * d_in, :]
        acc = acc + jnp.dot(xi, wi, preferred_element_type=jnp.float32)
    y = acc + b_ref[...]
    y = jnp.maximum(y, 0.0)                                  # ReLU
    # BatchNorm1d(affine=False), inference: (y - mean) * rsqrt(var + eps)
    y = (y - mean_ref[...]) * lax.rsqrt(var_ref[...] + BN_EPS)
    o_ref[0] = y


def tdnn_layer(x, w_t, b, bn_mean, bn_var, *, context, dilation):
    """x: (N, T_in, D_in); w_t: (context*D_in, D_out) (= torch weight transposed)."""
    n, t_in, d_in = x.shape
    d_out = w_t.shape[1]
    t_out = t_in - dilation * (context - 1)
    kernel = functools.partial(_tdnn_kernel, context=context, dilation=dilation,
                               t_out=t_out, d_in=d_in)
    flops = 2 * n * t_out * context * d_in * d_out
    bytes_accessed = 4 * (n * t_in * d_in + context * d_in * d_out
                          + 3 * d_out + n * t_out * d_out)
    return pl.pallas_call(
        kernel,
        out_shape=jax.ShapeDtypeStruct((n, t_out, d_out), jnp.float32),
        grid=(n,),
        in_specs=[
            pl.BlockSpec((1, t_in, d_in), lambda i: (i, 0, 0)),
            pl.BlockSpec((context * d_in, d_out), lambda i: (0, 0)),   # resident
            pl.BlockSpec((1, d_out), lambda i: (0, 0)),                # resident
            pl.BlockSpec((1, d_out), lambda i: (0, 0)),                # resident
            pl.BlockSpec((1, d_out), lambda i: (0, 0)),                # resident
        ],
        out_specs=pl.BlockSpec((1, t_out, d_out), lambda i: (i, 0, 0)),
        compiler_params=pltpu.CompilerParams(
            dimension_semantics=("parallel",),
            vmem_limit_bytes=32 * 1024 * 1024),
        cost_estimate=pl.CostEstimate(flops=flops, transcendentals=0,
                                      bytes_accessed=bytes_accessed),
    )(x, w_t, b.reshape(1, -1), bn_mean.reshape(1, -1), bn_var.reshape(1, -1))


# --------------------------------------------------------------------------
# Head: stats pooling + lin11 + LDA + normalize + WCCN/PLDA + pair scoring,
# all in one kernel.  Output is lane-dense (1, B).
# --------------------------------------------------------------------------
def _head_kernel(h_ref, w11a_ref, w11b_ref, b11_ref,
                 wlda_ref, blda_ref, wplda_ref, bplda_ref,
                 psqrt_ref, q_ref, out_ref, *, n_pairs, t_frames):
    n_utt = 2 * n_pairs
    inv_t = 1.0 / float(t_frames)
    inv_tm1 = 1.0 / float(t_frames - 1)

    means, stds = [], []
    for u in range(n_utt):                          # n_utt is small & static
        hu = h_ref[u]                               # (T, 1500)
        m = jnp.sum(hu, axis=0, keepdims=True) * inv_t          # (1, 1500)
        d = hu - m
        v = jnp.sum(d * d, axis=0, keepdims=True) * inv_tm1     # unbiased (torch.std)
        means.append(m)
        stds.append(jnp.sqrt(v))
    mean2 = jnp.concatenate(means, axis=0)          # (2B, 1500)
    std2 = jnp.concatenate(stds, axis=0)            # (2B, 1500)

    # stats pooling + lin11:  [mean, std] @ W11^T  ==  mean @ W11a + std @ W11b
    xvec = (jnp.dot(mean2, w11a_ref[...], preferred_element_type=jnp.float32)
            + jnp.dot(std2, w11b_ref[...], preferred_element_type=jnp.float32)
            + b11_ref[...])                          # (2B, 512)

    # centering_and_LDA + F.normalize (x / max(||x||,1e-12) == x * rsqrt(max(ss,1e-24)))
    y = jnp.dot(xvec, wlda_ref[...], preferred_element_type=jnp.float32) + blda_ref[...]
    ss = jnp.sum(y * y, axis=1, keepdims=True)
    y = y * lax.rsqrt(jnp.maximum(ss, 1e-24))

    # centering_and_wccn_plda
    z = jnp.dot(y, wplda_ref[...], preferred_element_type=jnp.float32) + bplda_ref[...]

    # pair scoring with pairs along the lane axis (lane-dense (1, B) store)
    zt = z.T                                        # (PLDA, 2B)
    z1 = zt[:, :n_pairs]
    z2 = zt[:, n_pairs:]
    p = psqrt_ref[...] * psqrt_ref[...]             # (PLDA, 1)  P = P_sqrt**2
    q = q_ref[...]                                  # (PLDA, 1)
    out_ref[...] = jnp.sum(z1 * q * z1 + z2 * q * z2 + 2.0 * z1 * p * z2,
                           axis=0, keepdims=True)   # (1, B)


def neural_plda_forward(x1, x2, params):
    """x1, x2: (B, 30, T) acoustic features (same layout the torch module takes)."""
    n_pairs = x1.shape[0]
    # Stack both sides of every trial -> one pass through the shared ETDNN trunk.
    x = jnp.concatenate([x1, x2], axis=0)                     # (2B, 30, T)
    x = jnp.transpose(x, (0, 2, 1)).astype(jnp.float32)       # (2B, T, 30)

    for lp in params["tdnn"]:
        x = tdnn_layer(x, lp["w_t"], lp["b"], lp["bn_mean"], lp["bn_var"],
                       context=lp["context"], dilation=lp["dilation"])

    t_frames = x.shape[1]
    w11_t = params["w11_t"]                                   # (3000, 512)
    out = pl.pallas_call(
        functools.partial(_head_kernel, n_pairs=n_pairs, t_frames=t_frames),
        out_shape=jax.ShapeDtypeStruct((1, n_pairs), jnp.float32),
        in_specs=[pl.BlockSpec(memory_space=pltpu.MemorySpace.VMEM)] * 10,
        out_specs=pl.BlockSpec(memory_space=pltpu.MemorySpace.VMEM),
        compiler_params=pltpu.CompilerParams(vmem_limit_bytes=32 * 1024 * 1024),
    )(x,
      w11_t[:1500, :], w11_t[1500:, :], params["b11"].reshape(1, -1),
      params["wlda_t"], params["blda"].reshape(1, -1),
      params["wplda_t"], params["bplda"].reshape(1, -1),
      params["p_sqrt"].reshape(-1, 1), params["q"].reshape(-1, 1))
    return out[0]                                             # (B,) trial scores


# --------------------------------------------------------------------------
# Pure-JAX reference (same torch semantics, high-precision matmuls)
# --------------------------------------------------------------------------
def ref_forward(x1, x2, params):
    hp = lax.Precision.HIGHEST

    def tdnn_ref(x, lp):
        ctx, dil = lp["context"], lp["dilation"]
        t_in = x.shape[1]
        t_out = t_in - dil * (ctx - 1)
        cols = [x[:, i * dil: i * dil + t_out, :] for i in range(ctx)]
        xf = jnp.concatenate(cols, axis=2)                    # F.unfold ordering
        y = jnp.einsum("nti,io->nto", xf, lp["w_t"], precision=hp) + lp["b"]
        y = jnp.maximum(y, 0.0)
        return (y - lp["bn_mean"]) / jnp.sqrt(lp["bn_var"] + BN_EPS)

    def embed(x):
        x = jnp.transpose(x, (0, 2, 1)).astype(jnp.float32)
        for lp in params["tdnn"]:
            x = tdnn_ref(x, lp)
        mean = jnp.mean(x, axis=1)
        std = jnp.std(x, axis=1, ddof=1)                      # torch.std (unbiased)
        pooled = jnp.concatenate([mean, std], axis=1)
        xvec = jnp.dot(pooled, params["w11_t"], precision=hp) + params["b11"]
        y = jnp.dot(xvec, params["wlda_t"], precision=hp) + params["blda"]
        y = y / jnp.maximum(jnp.linalg.norm(y, axis=1, keepdims=True), 1e-12)
        return jnp.dot(y, params["wplda_t"], precision=hp) + params["bplda"]

    z1, z2 = embed(x1), embed(x2)
    p = params["p_sqrt"] * params["p_sqrt"]
    q = params["q"]
    return ((z1 * q * z1).sum(axis=1) + (z2 * q * z2).sum(axis=1)
            + 2.0 * (z1 * p * z2).sum(axis=1))


# --------------------------------------------------------------------------
if __name__ == "__main__":
    B = 2            # trial pairs
    FEAT = 30        # acoustic feature dim (module hard-codes 30)
    T = 33           # input frames (>= 23 needed by the ETDNN receptive field)
    XVEC_DIM = 512   # lin11 output dim == nc.xvector_dim
    LDA_DIM = 128    # nc.layer1_LDA_dim
    PLDA_DIM = 128   # nc.layer2_PLDA_spkfactor_dim

    tdnn_cfg = [  # (d_in, d_out, context, dilation) — ETDNN 12-layer trunk
        (30, 512, 5, 1), (512, 512, 1, 1), (512, 512, 3, 2), (512, 512, 1, 1),
        (512, 512, 3, 3), (512, 512, 1, 1), (512, 512, 3, 4), (512, 512, 1, 1),
        (512, 512, 1, 1), (512, 1500, 1, 1),
    ]

    key = jax.random.PRNGKey(0)
    tdnn_params = []
    for (d_in, d_out, ctx, dil) in tdnn_cfg:
        key, k1, k2, k3, k4 = jax.random.split(key, 5)
        fan_in = ctx * d_in
        tdnn_params.append(dict(
            w_t=jax.random.normal(k1, (fan_in, d_out), jnp.float32)
                * jnp.sqrt(2.0 / fan_in),
            b=jax.random.normal(k2, (d_out,), jnp.float32) * 0.01,
            bn_mean=jax.random.uniform(k3, (d_out,), jnp.float32, -0.05, 0.05),
            bn_var=jax.random.uniform(k4, (d_out,), jnp.float32, 0.9, 1.1),
            context=ctx, dilation=dil))

    key, k1, k2, k3, k4, k5, k6, k7, k8 = jax.random.split(key, 9)
    params = dict(
        tdnn=tdnn_params,
        w11_t=jax.random.normal(k1, (3000, XVEC_DIM), jnp.float32)
              * jnp.sqrt(1.0 / 3000),
        b11=jax.random.normal(k2, (XVEC_DIM,), jnp.float32) * 0.01,
        wlda_t=jax.random.normal(k3, (XVEC_DIM, LDA_DIM), jnp.float32)
               * jnp.sqrt(1.0 / XVEC_DIM),
        blda=jax.random.normal(k4, (LDA_DIM,), jnp.float32) * 0.01,
        wplda_t=jax.random.normal(k5, (LDA_DIM, PLDA_DIM), jnp.float32)
                * jnp.sqrt(1.0 / LDA_DIM),
        bplda=jax.random.normal(k6, (PLDA_DIM,), jnp.float32) * 0.01,
        p_sqrt=jax.random.uniform(k7, (PLDA_DIM,), jnp.float32),   # torch.rand init
        q=jax.random.uniform(k8, (PLDA_DIM,), jnp.float32),
    )

    key, kx1, kx2 = jax.random.split(key, 3)
    x1 = jax.random.normal(kx1, (B, FEAT, T), jnp.float32)
    x2 = jax.random.normal(kx2, (B, FEAT, T), jnp.float32)

    s = neural_plda_forward(x1, x2, params)
    jax.block_until_ready(s)

    s_ref = ref_forward(x1, x2, params)
    assert s.shape == (B,), s.shape
    assert jnp.allclose(s, s_ref, rtol=1e-2, atol=1e-2), (s, s_ref)

    print("KERNEL_OK")
</pallas_src>

<mosaic_0001>
module attributes {stable_mosaic.version = 11 : i64} {
  func.func @_tdnn_kernel(%arg0: i32, %arg1: memref<1x33x30xf32, #tpu.memory_space<vmem>>, %arg2: memref<150x512xf32, #tpu.memory_space<vmem>>, %arg3: memref<1x512xf32, #tpu.memory_space<vmem>>, %arg4: memref<1x512xf32, #tpu.memory_space<vmem>>, %arg5: memref<1x512xf32, #tpu.memory_space<vmem>>, %arg6: memref<1x29x512xf32, #tpu.memory_space<vmem>>) attributes {dimension_semantics = [#tpu.dimension_semantics<parallel>], iteration_bounds = array<i64: 4>, scalar_prefetch = 0 : i64, scratch_operands = 0 : i64, tpu.core_type = #tpu.core_type<tc>, window_params = [{transform_indices = @transform_0, window_bounds = array<i64: 1, 33, 30>}, {pipeline_mode = #tpu.pipeline_mode<synchronous>, transform_indices = @transform_1, window_bounds = array<i64: 150, 512>}, {pipeline_mode = #tpu.pipeline_mode<synchronous>, transform_indices = @transform_2, window_bounds = array<i64: 1, 512>}, {pipeline_mode = #tpu.pipeline_mode<synchronous>, transform_indices = @transform_3, window_bounds = array<i64: 1, 512>}, {pipeline_mode = #tpu.pipeline_mode<synchronous>, transform_indices = @transform_4, window_bounds = array<i64: 1, 512>}, {transform_indices = @transform_5, window_bounds = array<i64: 1, 29, 512>}]} {
    %c0 = arith.constant 0 : index
    %c0_0 = arith.constant 0 : index
    %c0_1 = arith.constant 0 : index
    %0 = vector.load %arg1[%c0, %c0_0, %c0_1] : memref<1x33x30xf32, #tpu.memory_space<vmem>>, vector<1x33x30xf32>
    %1 = vector.shape_cast %0 : vector<1x33x30xf32> to vector<33x30xf32>
    %2 = vector.extract_strided_slice %1 {offsets = [0, 0], sizes = [29, 30], strides = [1, 1]} : vector<33x30xf32> to vector<29x30xf32>
    %c0_2 = arith.constant 0 : index
    %c0_3 = arith.constant 0 : index
    %3 = vector.load %arg2[%c0_2, %c0_3] : memref<150x512xf32, #tpu.memory_space<vmem>>, vector<30x512xf32>
    %cst = arith.constant dense<0.000000e+00> : vector<29x512xf32>
    %4 = tpu.matmul %2, %3, %cst {dimension_numbers = #tpu.dot_dimension_numbers<[1], [0], [0], [1], [0, 0, 1, 1], [], []>} : vector<29x30xf32>, vector<30x512xf32>, vector<29x512xf32> -> vector<29x512xf32>
    %5 = vector.extract_strided_slice %1 {offsets = [1, 0], sizes = [29, 30], strides = [1, 1]} : vector<33x30xf32> to vector<29x30xf32>
    %c30 = arith.constant 30 : index
    %c0_4 = arith.constant 0 : index
    %6 = vector.load %arg2[%c30, %c0_4] : memref<150x512xf32, #tpu.memory_space<vmem>>, vector<30x512xf32>
    %cst_5 = arith.constant dense<0.000000e+00> : vector<29x512xf32>
    %7 = tpu.matmul %5, %6, %cst_5 {dimension_numbers = #tpu.dot_dimension_numbers<[1], [0], [0], [1], [0, 0, 1, 1], [], []>} : vector<29x30xf32>, vector<30x512xf32>, vector<29x512xf32> -> vector<29x512xf32>
    %8 = arith.addf %4, %7 : vector<29x512xf32>
    %9 = vector.extract_strided_slice %1 {offsets = [2, 0], sizes = [29, 30], strides = [1, 1]} : vector<33x30xf32> to vector<29x30xf32>
    %c60 = arith.constant 60 : index
    %c0_6 = arith.constant 0 : index
    %10 = vector.load %arg2[%c60, %c0_6] : memref<150x512xf32, #tpu.memory_space<vmem>>, vector<30x512xf32>
    %cst_7 = arith.constant dense<0.000000e+00> : vector<29x512xf32>
    %11 = tpu.matmul %9, %10, %cst_7 {dimension_numbers = #tpu.dot_dimension_numbers<[1], [0], [0], [1], [0, 0, 1, 1], [], []>} : vector<29x30xf32>, vector<30x512xf32>, vector<29x512xf32> -> vector<29x512xf32>
    %12 = arith.addf %8, %11 : vector<29x512xf32>
    %13 = vector.extract_strided_slice %1 {offsets = [3, 0], sizes = [29, 30], strides = [1, 1]} : vector<33x30xf32> to vector<29x30xf32>
    %c90 = arith.constant 90 : index
    %c0_8 = arith.constant 0 : index
    %14 = vector.load %arg2[%c90, %c0_8] : memref<150x512xf32, #tpu.memory_space<vmem>>, vector<30x512xf32>
    %cst_9 = arith.constant dense<0.000000e+00> : vector<29x512xf32>
    %15 = tpu.matmul %13, %14, %cst_9 {dimension_numbers = #tpu.dot_dimension_numbers<[1], [0], [0], [1], [0, 0, 1, 1], [], []>} : vector<29x30xf32>, vector<30x512xf32>, vector<29x512xf32> -> vector<29x512xf32>
    %16 = arith.addf %12, %15 : vector<29x512xf32>
    %17 = vector.extract_strided_slice %1 {offsets = [4, 0], sizes = [29, 30], strides = [1, 1]} : vector<33x30xf32> to vector<29x30xf32>
    %c120 = arith.constant 120 : index
    %c0_10 = arith.constant 0 : index
    %18 = vector.load %arg2[%c120, %c0_10] : memref<150x512xf32, #tpu.memory_space<vmem>>, vector<30x512xf32>
    %cst_11 = arith.constant dense<0.000000e+00> : vector<29x512xf32>
    %19 = tpu.matmul %17, %18, %cst_11 {dimension_numbers = #tpu.dot_dimension_numbers<[1], [0], [0], [1], [0, 0, 1, 1], [], []>} : vector<29x30xf32>, vector<30x512xf32>, vector<29x512xf32> -> vector<29x512xf32>
    %20 = arith.addf %16, %19 : vector<29x512xf32>
    %c0_12 = arith.constant 0 : index
    %c0_13 = arith.constant 0 : index
    %21 = vector.load %arg3[%c0_12, %c0_13] : memref<1x512xf32, #tpu.memory_space<vmem>>, vector<1x512xf32>
    %22 = vector.broadcast %21 : vector<1x512xf32> to vector<29x512xf32>
    %23 = arith.addf %20, %22 : vector<29x512xf32>
    %cst_14 = arith.constant 0.000000e+00 : f32
    %24 = vector.broadcast %cst_14 : f32 to vector<29x512xf32>
    %25 = arith.maximumf %23, %24 : vector<29x512xf32>
    %c0_15 = arith.constant 0 : index
    %c0_16 = arith.constant 0 : index
    %26 = vector.load %arg4[%c0_15, %c0_16] : memref<1x512xf32, #tpu.memory_space<vmem>>, vector<1x512xf32>
    %27 = vector.broadcast %26 : vector<1x512xf32> to vector<29x512xf32>
    %28 = arith.subf %25, %27 : vector<29x512xf32>
    %c0_17 = arith.constant 0 : index
    %c0_18 = arith.constant 0 : index
    %29 = vector.load %arg5[%c0_17, %c0_18] : memref<1x512xf32, #tpu.memory_space<vmem>>, vector<1x512xf32>
    %cst_19 = arith.constant 9.99999974E-6 : f32
    %30 = vector.broadcast %cst_19 : f32 to vector<1x512xf32>
    %31 = arith.addf %29, %30 : vector<1x512xf32>
    %32 = math.rsqrt %31 : vector<1x512xf32>
    %33 = vector.broadcast %32 : vector<1x512xf32> to vector<29x512xf32>
    %34 = arith.mulf %28, %33 : vector<29x512xf32>
    %c0_20 = arith.constant 0 : index
    %c0_21 = arith.constant 0 : index
    %c0_22 = arith.constant 0 : index
    %35 = vector.load %arg6[%c0_20, %c0_21, %c0_22] : memref<1x29x512xf32, #tpu.memory_space<vmem>>, vector<1x29x512xf32>
    %36 = vector.shape_cast %35 : vector<1x29x512xf32> to vector<29x512xf32>
    %37 = vector.shape_cast %34 : vector<29x512xf32> to vector<1x29x512xf32>
    tpu.vector_store %arg6[%c0_20, %c0_21, %c0_22], %37 {strides = array<i32>} : memref<1x29x512xf32, #tpu.memory_space<vmem>>, vector<1x29x512xf32>,
    return
  }
  func.func @transform_0(%arg0: i32) -> (i32, i32, i32) {
    %c0_i32 = arith.constant 0 : i32
    %c0_i32_0 = arith.constant 0 : i32
    %c0_i32_1 = arith.constant 0 : i32
    return %arg0, %c0_i32, %c0_i32_0 : i32, i32, i32
  }
  func.func @transform_1(%arg0: i32) -> (i32, i32) {
    %c0_i32 = arith.constant 0 : i32
    %c0_i32_0 = arith.constant 0 : i32
    %c0_i32_1 = arith.constant 0 : i32
    return %c0_i32, %c0_i32_0 : i32, i32
  }
  func.func @transform_2(%arg0: i32) -> (i32, i32) {
    %c0_i32 = arith.constant 0 : i32
    %c0_i32_0 = arith.constant 0 : i32
    %c0_i32_1 = arith.constant 0 : i32
    return %c0_i32, %c0_i32_0 : i32, i32
  }
  func.func @transform_3(%arg0: i32) -> (i32, i32) {
    %c0_i32 = arith.constant 0 : i32
    %c0_i32_0 = arith.constant 0 : i32
    %c0_i32_1 = arith.constant 0 : i32
    return %c0_i32, %c0_i32_0 : i32, i32
  }
  func.func @transform_4(%arg0: i32) -> (i32, i32) {
    %c0_i32 = arith.constant 0 : i32
    %c0_i32_0 = arith.constant 0 : i32
    %c0_i32_1 = arith.constant 0 : i32
    return %c0_i32, %c0_i32_0 : i32, i32
  }
  func.func @transform_5(%arg0: i32) -> (i32, i32, i32) {
    %c0_i32 = arith.constant 0 : i32
    %c0_i32_0 = arith.constant 0 : i32
    %c0_i32_1 = arith.constant 0 : i32
    return %arg0, %c0_i32, %c0_i32_0 : i32, i32, i32
  }
}

</mosaic_0001>

<bundles_post_ra>
// kernel: tpu_custom_call.1
= control target key start
LH: loop header
LB: loop body
LE: loop exit
PB: predicated region body
PF: predicated region fallthrough
CT: control target
= control target key end

     0   :  { %10 = vsyncpa [#allocation3], 0  ;;  %s1684_s18 = smov 0   ;;  %s2128_s0 = inlined_call_operand.vmem [shape: f32[4,33,30], index: 0, kind: input, shape index: {}]   ;;  %s2129_s1 = inlined_call_operand.hbm [shape: f32[150,512], index: 1, kind: input, shape index: {}]   ;;  %s2130_s2 = inlined_call_operand.vmem [shape: f32[1,512], index: 2, kind: input, shape index: {}]   ;;  %s2131_s3 = inlined_call_operand.vmem [shape: f32[1,512], index: 3, kind: input, shape index: {}]   ;;  %s2132_s4 = inlined_call_operand.vmem [shape: f32[1,512], index: 4, kind: input, shape index: {}]   ;;  %s2133_s5 = inlined_call_operand.vmem [shape: f32[4,29,512], index: 5, kind: output, shape index: {}]  }
   0x1 LB: > { %s168_s21 = sshll.u32 %s2129_s1, 4  ;;  %s1472_s22 = sadd.s32 4294967295, %s1649_s18   ;;  %s1649_s18 = sphi %s1684_s18, %s16_s18   ;;  %s169_s21 = int_to_ptr.hbm [resolvable:$true] %s168_s21 }
   0x2   : > { %p1474_p0 = scmp.ge.s32.totalorder %s1649_s18, 1  ;;  %p157_p1 = scmp.lt.s32.totalorder %s1649_s18, 5 }
   0x3   : > { %p1594_p2 = scmp.eq.s32.totalorder %s1472_s22, 0  ;;  %s1651_s23 = smov [#allocation2]  }
   0x4   : > { %p158_p3 = pnand %p1474_p0, %p157_p1  ;;  %s170_s24 = sshll.u32 %s1651_s23, 4  ;;  %s171_s24 = int_to_ptr.vmem [resolvable:$true] %s170_s24 }
   0x5   : > { %s1652_s25 = smov 512   ;;  %s1653_s26 = smov 32  }
   0x6   : > { %p1590_p4 = pneg %p158_p3  ;;  %203 = sbr.rel (%p158_p3) target bundleno = 323 (0x143), region = 40 }
   0x8   : > { %p1591_p5 = pnand %p1594_p2, %p1590_p4 }
   0xa   : > { %1593 = dma.hbm_to_vmem [thread:$0]  (!%p1591_p5), %s169_s21, 9728, %s171_s24, [#allocation3], %s1652_s25, %s1652_s25, %s1653_s26  }
   0xb   : > { %1644 = dma.done.wait (%p1594_p2), [#allocation3], 9728  }
   0xc   : > { %1646 = vsyncadd (%p1594_p2), [#allocation3], 4294957568  ;;  %p232_p6 = scmp.lt.s32.totalorder %s1472_s22, 3  ;;  %vm315_vm0 = vcmask 1041408   ;;  %v275_v0 = vld [vmem:[#allocation2 + $0xc0] sm:$0xff]  ;;  %vm373_vm1 = vcmask 1045504  }
   0xd   : > { %v279_v1 = vld [vmem:[#allocation2 + $0xe0] sm:$0xf]  ;;  %v276_v2 = vld [vmem:[#allocation2 + $0xc8] sm:$0xff]  ;;  %v336_v3 = vrot.slane %v275_v0, 6  ;;  %v277_v7 = vld [vmem:[#allocation2 + $0xd0] sm:$0xff]  ;;  %vm287_vm2 = vcmask 1046528  }
   0xe   : > { %s2135_s22 = smov (!%p232_p6, %s1472_s22), 3  ;;  %v344_v4 = vrot.slane %v279_v1, 6  ;;  %v280_v5 = vld [vmem:[#allocation2 + $0xe8] sm:$0xf]  ;;  %v338_v6 = vrot.slane %v276_v2, 6  ;;  %v340_v10 = vrot.slane %v277_v7, 6 }
   0xf   : > { %s1585_s27 = smul.u32 40, %s2135_s22  ;;  %v346_v8 = vrot.slane %v280_v5, 6  ;;  %v281_v9 = vld [vmem:[#allocation2 + $0xf0] sm:$0xf]  ;;  %v278_v11 = vld [vmem:[#allocation2 + $0xd8] sm:$0xff]  ;;  %v271_v12 = vld [vmem:[#allocation2 + $0xa0] sm:$0xff] }
  0x10   : > { %v345_v13 = vsel %vm315_vm0, %v336_v3, %v344_v4  ;;  %v348_v14 = vrot.slane %v281_v9, 6  ;;  %v282_v15 = vld [vmem:[#allocation2 + $0xf8] sm:$0xf]  ;;  %v342_v16 = vrot.slane %v278_v11, 6  ;;  %v328_v17 = vrot.slane %v271_v12, 6  ;;  %v272_v18 = vld [vmem:[#allocation2 + $0xa8] sm:$0xff] }
  0x11   : > { %1482 = vmatpush.msk.msra.mxu0 %vm373_vm1, %v345_v13  ;;  %v347_v19 = vsel %vm315_vm0, %v338_v6, %v346_v8  ;;  %v350_v20 = vrot.slane %v282_v15, 6  ;;  %v330_v21 = vrot.slane %v272_v18, 6  ;;  %v273_v22 = vld [vmem:[#allocation2 + $0xb0] sm:$0xff]  ;;  %v274_v23 = vld [vmem:[#allocation2 + $0xb8] sm:$0xff]  ;;  %v267_v24 = vld [vmem:[#allocation2 + $0x80] sm:$0xff]  ;;  %vm364_vm3 = vcmask 244736   ;;  %s1709_s30 = scalar_lea.vmem %s2128_s0, %s1585_s27 }
  0x12   : > { %1487 = vmatpush.msk.msra.mxu1 %vm373_vm1, %v347_v19  ;;  %v349_v25 = vsel %vm315_vm0, %v340_v10, %v348_v14  ;;  %v337_v26 = vsel %vm315_vm0, %v328_v17, %v336_v3  ;;  %v332_v27 = vrot.slane %v273_v22, 6  ;;  %v334_v28 = vrot.slane %v274_v23, 6  ;;  %v268_v29 = vld [vmem:[#allocation2 + $0x88] sm:$0xff]  ;;  %v269_v30 = vld [vmem:[#allocation2 + $0x90] sm:$0xff]  ;;  %v270_v31 = vld [vmem:[#allocation2 + $0x98] sm:$0xff]  ;;  %s1584_s12 = sshll.u32 %s2135_s22, 7 }
  0x13   : > { %1492 = vmatpush.msk.msra.mxu2 %vm373_vm1, %v349_v25  ;;  %v351_v32 = vsel %vm315_vm0, %v342_v16, %v350_v20  ;;  %395 = vmatpush.msra.mxu0 %v337_v26  ;;  %v339_v33 = vsel %vm315_vm0, %v330_v21, %v338_v6  ;;  %v317_v34 = vrot.slane %v267_v24, 6  ;;  %v320_v35 = vrot.slane %v268_v29, 6  ;;  %v263_v36 = vld [vmem:[#allocation2 + $0x60] sm:$0xc0]  ;;  %v264_v37 = vld [vmem:[#allocation2 + $0x68] sm:$0xc0]  ;;  %s2024_s15 = scalar_lea.vmem %s2133_s5, %s1584_s12 }
  0x14   : > { %1497 = vmatpush.msk.msra.mxu3 %vm373_vm1, %v351_v32  ;;  %424 = vmatpush.msra.mxu1 %v339_v33  ;;  %v341_v38 = vsel %vm315_vm0, %v332_v27, %v340_v10  ;;  %v343_v39 = vsel %vm315_vm0, %v334_v28, %v342_v16  ;;  %v323_v40 = vrot.slane %v269_v30, 6  ;;  %v326_v41 = vrot.slane %v270_v31, 6  ;;  %v265_v42 = vld [vmem:[#allocation2 + $0x70] sm:$0xc0]  ;;  %v266_v43 = vld [vmem:[#allocation2 + $0x78] sm:$0xc0] }
  0x15   : > { %453 = vmatpush.msra.mxu2 %v341_v38  ;;  %v329_v44 = vsel %vm315_vm0, %v317_v34, %v328_v17  ;;  %v331_v45 = vsel %vm315_vm0, %v320_v35, %v330_v21  ;;  %v316_v46 = vrot.slane %v263_v36, 6  ;;  %v319_v47 = vrot.slane %v264_v37, 6  ;;  %v1720_v48 = vld [vmem:[%s1709_s30] sm:$0xff]  ;;  %v1723_v49 = vld [vmem:[%s1709_s30 + $0x8] sm:$0xff]  ;;  %v1734_v60 = vld [vmem:[%s1709_s30 + $0x10] sm:$0xff] }
  0x16   : > { %482 = vmatpush.msra.mxu3 %v343_v39  ;;  %396 = vmatpush.msra.mxu0 %v329_v44  ;;  %v333_v50 = vsel %vm315_vm0, %v323_v40, %v332_v27  ;;  %v335_v51 = vsel %vm315_vm0, %v326_v41, %v334_v28  ;;  %v322_v52 = vrot.slane %v265_v42, 6  ;;  %v325_v53 = vrot.slane %v266_v43, 6  ;;  %v261_v62 = vld [vmem:[#allocation2 + $0x70] sm:$0x3f]  ;;  %v262_v63 = vld [vmem:[#allocation2 + $0x78] sm:$0x3f] }
  0x17   : > { %425 = vmatpush.msra.mxu1 %v331_v45  ;;  %454 = vmatpush.msra.mxu2 %v333_v50  ;;  %v318_v54 = vsel %vm315_vm0, %v316_v46, %v317_v34  ;;  %v321_v55 = vsel %vm315_vm0, %v319_v47, %v320_v35  ;;  %v288_v56 = vrot.slane %v1720_v48, 1  ;;  %v289_v57 = vrot.slane %v1723_v49, 1  ;;  %v259_v0 = vld [vmem:[#allocation2 + $0x60] sm:$0x3f]  ;;  %v260_v1 = vld [vmem:[#allocation2 + $0x68] sm:$0x3f] }
  0x18   : > { %483 = vmatpush.msra.mxu3 %v335_v51  ;;  %397 = vmatpush.msra.mxu0 %v318_v54  ;;  %v324_v58 = vsel %vm315_vm0, %v322_v52, %v323_v40  ;;  %v327_v59 = vsel %vm315_vm0, %v325_v53, %v326_v41  ;;  %v257_v2 = vld [vmem:[#allocation2 + $0x50] sm:$0xff]  ;;  %v258_v3 = vld [vmem:[#allocation2 + $0x58] sm:$0xff]  ;;  %v291_v4 = vrot.slane %v1734_v60, 1  ;;  %v255_v5 = vld [vmem:[#allocation2 + $0x40] sm:$0xff]  ;;  %vm681_vm4 = vcmask 1043456  }
  0x19   : > { %426 = vmatpush.msra.mxu1 %v321_v55  ;;  %455 = vmatpush.msra.mxu2 %v324_v58  ;;  %v290_v61 = vsel %vm287_vm2, %v288_v56, %v289_v57  ;;  %v256_v6 = vld [vmem:[#allocation2 + $0x48] sm:$0xff]  ;;  %v253_v7 = vld [vmem:[#allocation2 + $0x30] sm:$0xff]  ;;  %v254_v8 = vld [vmem:[#allocation2 + $0x38] sm:$0xff]  ;;  %vm894_vm5 = vcmask 1044480  }
  0x1a   : > { %484 = vmatpush.msra.mxu3 %v327_v59  ;;  %1483 = vmatmul.msk.f32.vlgmr.msra.gmra.mxu0 %vm364_vm3, %v290_v61  ;;  %v1743_v9 = vld [vmem:[#allocation2 + $0x150] sm:$0xff]  ;;  %v1748_v11 = vld [vmem:[%s1709_s30 + $0x18] sm:$0xff]  ;;  %v646_v14 = vld [vmem:[#allocation2 + $0x140] sm:$0xff]  ;;  %v292_v18 = vsel %vm287_vm2, %v289_v57, %v291_v4 }
  0x1b   : > { %1488 = vmatmul.msk.f32.vlgmr.msra.gmra.mxu1 %vm364_vm3, %v290_v61  ;;  %1493 = vmatmul.msk.f32.vlgmr.msra.gmra.mxu2 %vm364_vm3, %v290_v61  ;;  %v652_v10 = vld [vmem:[#allocation2 + $0x170] sm:$0x3]  ;;  %v649_v12 = vld [vmem:[#allocation2 + $0x158] sm:$0xff]  ;;  %v251_v15 = vld [vmem:[#allocation2 + $0x20] sm:$0xff]  ;;  %v706_v20 = vrot.slane %v1743_v9, 4  ;;  %v702_v25 = vrot.slane %v646_v14, 4 }
  0x1c   : > { %1498 = vmatmul.msk.f32.vlgmr.msra.gmra.mxu3 %vm364_vm3, %v290_v61  ;;  %1512 = vmatpush.msk.msrb.mxu2 %vm373_vm1, %v261_v62  ;;  %v653_v13 = vld [vmem:[#allocation2 + $0x178] sm:$0x3]  ;;  %v650_v16 = vld [vmem:[#allocation2 + $0x160] sm:$0x3]  ;;  %v647_v17 = vld [vmem:[#allocation2 + $0x148] sm:$0xff]  ;;  %v714_v21 = vrot.slane %v652_v10, 4 }
  0x1d   : > { %1517 = vmatpush.msk.msrb.mxu3 %vm373_vm1, %v262_v63  ;;  %1502 = vmatpush.msk.msrb.mxu0 %vm373_vm1, %v259_v0  ;;  %v252_v19 = vld [vmem:[#allocation2 + $0x28] sm:$0xff]  ;;  %v708_v23 = vrot.slane %v649_v12, 4  ;;  %v716_v24 = vrot.slane %v653_v13, 4  ;;  %v710_v26 = vrot.slane %v650_v16, 4  ;;  %v249_v27 = vld [vmem:[#allocation2 + $0x10] sm:$0xff]  ;;  %v704_v28 = vrot.slane %v647_v17, 4 }
  0x1e   : > { %1507 = vmatpush.msk.msrb.mxu1 %vm373_vm1, %v260_v1  ;;  %589 = vmatpush.msrb.mxu2 %v257_v2  ;;  %v651_v22 = vld [vmem:[#allocation2 + $0x168] sm:$0x3]  ;;  %v293_v30 = vrot.slane %v1748_v11, 1  ;;  %v250_v31 = vld [vmem:[#allocation2 + $0x18] sm:$0xff]  ;;  %v247_v32 = vld [vmem:[#allocation2] sm:$0xff]  ;;  %v715_v34 = vsel %vm681_vm4, %v706_v20, %v714_v21 }
  0x1f   : > { %618 = vmatpush.msrb.mxu3 %v258_v3  ;;  %531 = vmatpush.msrb.mxu0 %v255_v5  ;;  %v712_v29 = vrot.slane %v651_v22, 4  ;;  %v248_v33 = vld [vmem:[#allocation2 + $0x8] sm:$0xff]  ;;  %v717_v35 = vsel %vm681_vm4, %v708_v23, %v716_v24  ;;  %v711_v36 = vsel %vm681_vm4, %v702_v25, %v710_v26  ;;  %v644_v37 = vld [vmem:[#allocation2 + $0x130] sm:$0xff]  ;;  %v645_v38 = vld [vmem:[#allocation2 + $0x138] sm:$0xff] }
  0x20   : > { %560 = vmatpush.msrb.mxu1 %v256_v6  ;;  %590 = vmatpush.msrb.mxu2 %v253_v7  ;;  %v642_v39 = vld [vmem:[#allocation2 + $0x120] sm:$0xff]  ;;  %v698_v41 = vrot.slane %v644_v37, 4  ;;  %v700_v42 = vrot.slane %v645_v38, 4  ;;  %v643_v44 = vld [vmem:[#allocation2 + $0x128] sm:$0xff]  ;;  %v294_v45 = vsel %vm287_vm2, %v291_v4, %v293_v30  ;;  %v640_v53 = vld [vmem:[#allocation2 + $0x110] sm:$0xff] }
  0x21   : > { %619 = vmatpush.msrb.mxu3 %v254_v8  ;;  %532 = vmatpush.msrb.mxu0 %v251_v15  ;;  %v713_v40 = vsel %vm681_vm4, %v704_v28, %v712_v29  ;;  %v694_v43 = vrot.slane %v642_v39, 4  ;;  %v696_v46 = vrot.slane %v643_v44, 4  ;;  %v641_v54 = vld [vmem:[#allocation2 + $0x118] sm:$0xff]  ;;  %v638_v55 = vld [vmem:[#allocation2 + $0x100] sm:$0xff]  ;;  %v689_v56 = vrot.slane %v640_v53, 4  ;;  %v639_v59 = vld [vmem:[#allocation2 + $0x108] sm:$0xff] }
  0x22   : > { %1484 = vmatmul.msk.f32.gmra.mxu0 %vm364_vm3, %v292_v18  ;;  %561 = vmatpush.msrb.mxu1 %v252_v19  ;;  %v707_v47 = vsel %vm681_vm4, %v698_v41, %v706_v20  ;;  %v709_v50 = vsel %vm681_vm4, %v700_v42, %v708_v23  ;;  %v692_v57 = vrot.slane %v641_v54, 4  ;;  %v683_v58 = vrot.slane %v638_v55, 4  ;;  %v636_v2 = vld [vmem:[#allocation2 + $0xf0] sm:$0xf0]  ;;  %v637_v3 = vld [vmem:[#allocation2 + $0xf8] sm:$0xf0] }
  0x23   : > { %1489 = vmatmul.msk.f32.gmra.mxu1 %vm364_vm3, %v292_v18  ;;  %1494 = vmatmul.msk.f32.gmra.mxu2 %vm364_vm3, %v292_v18  ;;  %v703_v51 = vsel %vm681_vm4, %v694_v43, %v702_v25  ;;  %v705_v52 = vsel %vm681_vm4, %v696_v46, %v704_v28  ;;  %v686_v61 = vrot.slane %v639_v59, 4  ;;  %v699_v62 = vsel %vm681_vm4, %v689_v56, %v698_v41  ;;  %v634_v4 = vld [vmem:[#allocation2 + $0xe0] sm:$0xf0]  ;;  %v635_v8 = vld [vmem:[#allocation2 + $0xe8] sm:$0xf0]  ;;  %v892_v15 = vld [vmem:[#allocation2 + $0x1d0] sm:$0xff] }
  0x24   : > { %1499 = vmatmul.msk.f32.gmra.mxu3 %vm364_vm3, %v292_v18  ;;  %591 = vmatpush.msrb.mxu2 %v249_v27  ;;  %v701_v63 = vsel %vm681_vm4, %v692_v57, %v700_v42  ;;  %v695_v0 = vsel %vm681_vm4, %v683_v58, %v694_v43  ;;  %v688_v5 = vrot.slane %v636_v2, 4  ;;  %v691_v6 = vrot.slane %v637_v3, 4  ;;  %v893_v16 = vld [vmem:[#allocation2 + $0x1d8] sm:$0xff]  ;;  %v890_v17 = vld [vmem:[#allocation2 + $0x1c0] sm:$0xff]  ;;  %v891_v21 = vld [vmem:[#allocation2 + $0x1c8] sm:$0xff] }
  0x25   : > { %620 = vmatpush.msrb.mxu3 %v250_v31  ;;  %533 = vmatpush.msrb.mxu0 %v247_v32  ;;  %v697_v1 = vsel %vm681_vm4, %v686_v61, %v696_v46  ;;  %v682_v7 = vrot.slane %v634_v4, 4  ;;  %v685_v9 = vrot.slane %v635_v8, 4  ;;  %v942_v18 = vrot.slane %v892_v15, 2  ;;  %v888_v23 = vld [vmem:[#allocation2 + $0x1b0] sm:$0xff]  ;;  %v889_v24 = vld [vmem:[#allocation2 + $0x1b8] sm:$0xff]  ;;  %v886_v25 = vld [vmem:[#allocation2 + $0x1a0] sm:$0xff] }
  0x26   : > { %562 = vmatpush.msrb.mxu1 %v248_v33  ;;  %1532 = vmatpush.msk.msra.mxu2 %vm373_vm1, %v715_v34  ;;  %v690_v10 = vsel %vm681_vm4, %v688_v5, %v689_v56  ;;  %v693_v12 = vsel %vm681_vm4, %v691_v6, %v692_v57  ;;  %v944_v19 = vrot.slane %v893_v16, 2  ;;  %v938_v20 = vrot.slane %v890_v17, 2  ;;  %v887_v29 = vld [vmem:[#allocation2 + $0x1a8] sm:$0xff]  ;;  %v882_v37 = vld [vmem:[#allocation2 + $0x180] sm:$0xff]  ;;  %v1120_v2 = vld [vmem:[#allocation2 + $0x250] sm:$0x3f] }
  0x27   : > { %1537 = vmatpush.msk.msra.mxu3 %vm373_vm1, %v717_v35  ;;  %1522 = vmatpush.msk.msra.mxu0 %vm373_vm1, %v711_v36  ;;  %v684_v13 = vsel %vm681_vm4, %v682_v7, %v683_v58  ;;  %v687_v14 = vsel %vm681_vm4, %v685_v9, %v686_v61  ;;  %v940_v22 = vrot.slane %v891_v21, 2  ;;  %v934_v26 = vrot.slane %v888_v23, 2  ;;  %v884_v35 = vld [vmem:[#allocation2 + $0x190] sm:$0xff]  ;;  %v885_v36 = vld [vmem:[#allocation2 + $0x198] sm:$0xff]  ;;  %v883_v41 = vld [vmem:[#allocation2 + $0x188] sm:$0xff] }
  0x28   : > { %1527 = vmatpush.msk.msra.mxu1 %vm373_vm1, %v713_v40  ;;  %817 = vmatpush.msra.mxu2 %v707_v47  ;;  %v936_v27 = vrot.slane %v889_v24, 2  ;;  %v930_v28 = vrot.slane %v886_v25, 2  ;;  %v925_v38 = vrot.slane %v884_v35, 2  ;;  %v928_v39 = vrot.slane %v885_v36, 2  ;;  %v878_v53 = vld [vmem:[#allocation2 + $0x160] sm:$0xfc] }
  0x29   : > { %846 = vmatpush.msra.mxu3 %v709_v50  ;;  %759 = vmatpush.msra.mxu0 %v703_v51  ;;  %v943_v31 = vsel %vm373_vm1, %v934_v26, %v942_v18  ;;  %v919_v40 = vrot.slane %v882_v37, 2  ;;  %v922_v42 = vrot.slane %v883_v41, 2  ;;  %v654_v47 = vrot.slane %v1720_v48, 2  ;;  %v880_v51 = vld [vmem:[#allocation2 + $0x170] sm:$0xfc]  ;;  %v1117_v9 = vld [vmem:[#allocation2 + $0x238] sm:$0xff] }
  0x2a   : > { %1485 = vmatmul.msk.f32.gmra.mxu0 %vm364_vm3, %v294_v45  ;;  %788 = vmatpush.msra.mxu1 %v705_v52  ;;  %v945_v32 = vsel %vm373_vm1, %v936_v27, %v944_v19  ;;  %v939_v33 = vsel %vm373_vm1, %v930_v28, %v938_v20  ;;  %v935_v43 = vsel %vm373_vm1, %v925_v38, %v934_v26  ;;  %v655_v50 = vrot.slane %v1723_v49, 2  ;;  %v881_v52 = vld [vmem:[#allocation2 + $0x178] sm:$0xfc]  ;;  %v879_v57 = vld [vmem:[#allocation2 + $0x168] sm:$0xfc]  ;;  %v1116_v8 = vld [vmem:[#allocation2 + $0x230] sm:$0xff] }
  0x2b   : > { %1490 = vmatmul.msk.f32.gmra.mxu1 %vm364_vm3, %v294_v45  ;;  %1495 = vmatmul.msk.f32.gmra.mxu2 %vm364_vm3, %v294_v45  ;;  %v937_v44 = vsel %vm373_vm1, %v928_v39, %v936_v27  ;;  %v924_v54 = vrot.slane %v880_v51, 2  ;;  %v927_v55 = vrot.slane %v881_v52, 2  ;;  %v918_v56 = vrot.slane %v878_v53, 2  ;;  %v1121_v3 = vld [vmem:[#allocation2 + $0x258] sm:$0x3f]  ;;  %v1110_v16 = vld [vmem:[#allocation2 + $0x200] sm:$0xff] }
  0x2c   : > { %1500 = vmatmul.msk.f32.gmra.mxu3 %vm364_vm3, %v294_v45  ;;  %818 = vmatpush.msra.mxu2 %v699_v62  ;;  %v931_v45 = vsel %vm373_vm1, %v919_v40, %v930_v28  ;;  %v921_v58 = vrot.slane %v879_v57, 2  ;;  %v656_v59 = vsel %vm373_vm1, %v654_v47, %v655_v50  ;;  %v1118_v4 = vld [vmem:[#allocation2 + $0x240] sm:$0x3f]  ;;  %v1119_v5 = vld [vmem:[#allocation2 + $0x248] sm:$0x3f]  ;;  %v659_v7 = vrot.slane %v1748_v11, 2 }
  0x2d   : > { %847 = vmatpush.msra.mxu3 %v701_v63  ;;  %760 = vmatpush.msra.mxu0 %v695_v0  ;;  %v926_v61 = vsel %vm373_vm1, %v924_v54, %v925_v38  ;;  %v929_v62 = vsel %vm373_vm1, %v927_v55, %v928_v39  ;;  %v920_v63 = vsel %vm373_vm1, %v918_v56, %v919_v40  ;;  %v1113_v15 = vld [vmem:[#allocation2 + $0x218] sm:$0xff]  ;;  %v1111_v17 = vld [vmem:[#allocation2 + $0x208] sm:$0xff]  ;;  %v1106_v23 = vld [vmem:[#allocation2 + $0x1e0] sm:$0xff]  ;;  %v898_v25 = vrot.slane %v1734_v60, 3 }
  0x2e   : > { %789 = vmatpush.msra.mxu1 %v697_v1  ;;  %819 = vmatpush.msra.mxu2 %v690_v10  ;;  %v923_v0 = vsel %vm373_vm1, %v921_v58, %v922_v42  ;;  %v657_v1 = vrot.slane %v1734_v60, 2  ;;  %v1114_v10 = vld [vmem:[#allocation2 + $0x220] sm:$0xff]  ;;  %v1109_v21 = vld [vmem:[#allocation2 + $0x1f8] sm:$0xff]  ;;  %v1107_v24 = vld [vmem:[#allocation2 + $0x1e8] sm:$0xff]  ;;  %v900_v27 = vrot.slane %v1748_v11, 3  ;;  %v1128_v38 = vrot.slane %v1748_v11, 4 }
  0x2f   : > { %848 = vmatpush.msra.mxu3 %v693_v12  ;;  %761 = vmatpush.msra.mxu0 %v684_v13  ;;  %v1115_v12 = vld [vmem:[#allocation2 + $0x228] sm:$0xff] }
  0x30   : > { %790 = vmatpush.msra.mxu1 %v687_v14  ;;  %v658_v6 = vsel %vm373_vm1, %v655_v50, %v657_v1  ;;  %v660_v13 = vsel %vm373_vm1, %v657_v1, %v659_v7  ;;  %v1112_v14 = vld [vmem:[#allocation2 + $0x210] sm:$0xff]  ;;  %v901_v28 = vsel %vm894_vm5, %v898_v25, %v900_v27 }
  0x32   : > { %1486 = vmatmul.msk.f32.gmra.mxu0 %vm364_vm3, %v293_v30 }
  0x33   : > { %1491 = vmatmul.msk.f32.gmra.mxu1 %vm364_vm3, %v293_v30  ;;  %1496 = vmatmul.msk.f32.gmra.mxu2 %vm364_vm3, %v293_v30 }
  0x34   : > { %1501 = vmatmul.msk.f32.gmra.mxu3 %vm364_vm3, %v293_v30  ;;  %v932_v30 = vrot.slane %v887_v29, 2  ;;  %v1123_v29 = vrot.slane %v1720_v48, 4 }
  0x36   : > { %v941_v34 = vsel %vm373_vm1, %v932_v30, %v940_v22  ;;  %v933_v46 = vsel %vm373_vm1, %v922_v42, %v932_v30  ;;  %v1124_v30 = vrot.slane %v1723_v49, 4 }
  0x3a   : > { %1503 = vmatmul.msk.f32.vlgmr.msrb.gmra.mxu0 %vm364_vm3, %v1720_v48 }
  0x3b   : > { %1508 = vmatmul.msk.f32.vlgmr.msrb.gmra.mxu1 %vm364_vm3, %v1720_v48  ;;  %1513 = vmatmul.msk.f32.vlgmr.msrb.gmra.mxu2 %vm364_vm3, %v1720_v48 }
  0x3c   : > { %1518 = vmatmul.msk.f32.vlgmr.msrb.gmra.mxu3 %vm364_vm3, %v1720_v48  ;;  %1552 = vmatpush.msk.msrb.mxu2 %vm373_vm1, %v942_v18  ;;  %v895_v18 = vrot.slane %v1720_v48, 3 }
  0x3d   : > { %1557 = vmatpush.msk.msrb.mxu3 %vm373_vm1, %v944_v19  ;;  %1542 = vmatpush.msk.msrb.mxu0 %vm373_vm1, %v938_v20  ;;  %v896_v19 = vrot.slane %v1723_v49, 3  ;;  %v1108_v20 = vld [vmem:[#allocation2 + $0x1f0] sm:$0xff] }
  0x3e   : > { %1547 = vmatpush.msk.msrb.mxu1 %vm373_vm1, %v940_v22  ;;  %1045 = vmatpush.msrb.mxu2 %v943_v31 }
  0x3f   : > { %1074 = vmatpush.msrb.mxu3 %v945_v32  ;;  %987 = vmatpush.msrb.mxu0 %v939_v33  ;;  %v897_v22 = vsel %vm894_vm5, %v895_v18, %v896_v19  ;;  %v899_v26 = vsel %vm894_vm5, %v896_v19, %v898_v25  ;;  %v1125_v32 = vsel %vm681_vm4, %v1123_v29, %v1124_v30 }
  0x40   : > { %1016 = vmatpush.msrb.mxu1 %v941_v34  ;;  %1046 = vmatpush.msrb.mxu2 %v935_v43  ;;  %v1126_v34 = vrot.slane %v1734_v60, 4  ;;  %v246_v43 = vld [vmem:[%s1709_s30 + $0x20] sm:$0x1] }
  0x41   : > { %1075 = vmatpush.msrb.mxu3 %v937_v44  ;;  %988 = vmatpush.msrb.mxu0 %v931_v45  ;;  %v1130_v44 = vrot.slane %v246_v43, 4 }
  0x42   : > { %1504 = vmatmul.msk.f32.gmra.mxu0 %vm364_vm3, %v1723_v49  ;;  %1017 = vmatpush.msrb.mxu1 %v933_v46  ;;  %v1127_v36 = vsel %vm681_vm4, %v1124_v30, %v1126_v34  ;;  %v1129_v41 = vsel %vm681_vm4, %v1126_v34, %v1128_v38 }
  0x43   : > { %1509 = vmatmul.msk.f32.gmra.mxu1 %vm364_vm3, %v1723_v49  ;;  %1514 = vmatmul.msk.f32.gmra.mxu2 %vm364_vm3, %v1723_v49  ;;  %v1131_v47 = vsel %vm681_vm4, %v1128_v38, %v1130_v44 }
  0x44   : > { %1519 = vmatmul.msk.f32.gmra.mxu3 %vm364_vm3, %v1723_v49  ;;  %1047 = vmatpush.msrb.mxu2 %v926_v61 }
  0x45   : > { %1076 = vmatpush.msrb.mxu3 %v929_v62  ;;  %989 = vmatpush.msrb.mxu0 %v920_v63 }
  0x46   : > { %1018 = vmatpush.msrb.mxu1 %v923_v0 }
  0x4a   : > { %1505 = vmatmul.msk.f32.gmra.mxu0 %vm364_vm3, %v1734_v60 }
  0x4b   : > { %1510 = vmatmul.msk.f32.gmra.mxu1 %vm364_vm3, %v1734_v60  ;;  %1515 = vmatmul.msk.f32.gmra.mxu2 %vm364_vm3, %v1734_v60 }
  0x4c   : > { %1520 = vmatmul.msk.f32.gmra.mxu3 %vm364_vm3, %v1734_v60 }
  0x52   : > { %1506 = vmatmul.msk.f32.gmra.mxu0 %vm364_vm3, %v1748_v11 }
  0x53   : > { %1511 = vmatmul.msk.f32.gmra.mxu1 %vm364_vm3, %v1748_v11  ;;  %1516 = vmatmul.msk.f32.gmra.mxu2 %vm364_vm3, %v1748_v11 }
  0x54   : > { %1521 = vmatmul.msk.f32.gmra.mxu3 %vm364_vm3, %v1748_v11 }
  0x5a   : > { %1523 = vmatmul.msk.f32.vlgmr.msra.gmra.mxu0 %vm364_vm3, %v656_v59 }
  0x5b   : > { %1528 = vmatmul.msk.f32.vlgmr.msra.gmra.mxu1 %vm364_vm3, %v656_v59  ;;  %1533 = vmatmul.msk.f32.vlgmr.msra.gmra.mxu2 %vm364_vm3, %v656_v59 }
  0x5c   : > { %1538 = vmatmul.msk.f32.vlgmr.msra.gmra.mxu3 %vm364_vm3, %v656_v59  ;;  %1572 = vmatpush.msk.msra.mxu2 %vm373_vm1, %v1120_v2 }
  0x5d   : > { %1577 = vmatpush.msk.msra.mxu3 %vm373_vm1, %v1121_v3  ;;  %1562 = vmatpush.msk.msra.mxu0 %vm373_vm1, %v1118_v4 }
  0x5e   : > { %1567 = vmatpush.msk.msra.mxu1 %vm373_vm1, %v1119_v5  ;;  %1223 = vmatpush.msra.mxu2 %v1116_v8 }
  0x5f   : > { %1252 = vmatpush.msra.mxu3 %v1117_v9  ;;  %1165 = vmatpush.msra.mxu0 %v1114_v10 }
  0x60   : > { %1194 = vmatpush.msra.mxu1 %v1115_v12  ;;  %1224 = vmatpush.msra.mxu2 %v1112_v14 }
  0x61   : > { %1253 = vmatpush.msra.mxu3 %v1113_v15  ;;  %1166 = vmatpush.msra.mxu0 %v1110_v16 }
  0x62   : > { %1524 = vmatmul.msk.f32.gmra.mxu0 %vm364_vm3, %v658_v6  ;;  %1195 = vmatpush.msra.mxu1 %v1111_v17 }
  0x63   : > { %1529 = vmatmul.msk.f32.gmra.mxu1 %vm364_vm3, %v658_v6  ;;  %1534 = vmatmul.msk.f32.gmra.mxu2 %vm364_vm3, %v658_v6 }
  0x64   : > { %1539 = vmatmul.msk.f32.gmra.mxu3 %vm364_vm3, %v658_v6  ;;  %1225 = vmatpush.msra.mxu2 %v1108_v20 }
  0x65   : > { %1254 = vmatpush.msra.mxu3 %v1109_v21  ;;  %1167 = vmatpush.msra.mxu0 %v1106_v23 }
  0x66   : > { %1196 = vmatpush.msra.mxu1 %v1107_v24 }
  0x6a   : > { %1525 = vmatmul.msk.f32.gmra.mxu0 %vm364_vm3, %v660_v13 }
  0x6b   : > { %1530 = vmatmul.msk.f32.gmra.mxu1 %vm364_vm3, %v660_v13  ;;  %1535 = vmatmul.msk.f32.gmra.mxu2 %vm364_vm3, %v660_v13 }
  0x6c   : > { %1540 = vmatmul.msk.f32.gmra.mxu3 %vm364_vm3, %v660_v13 }
  0x72   : > { %1526 = vmatmul.msk.f32.gmra.mxu0 %vm364_vm3, %v659_v7 }
  0x73   : > { %1531 = vmatmul.msk.f32.gmra.mxu1 %vm364_vm3, %v659_v7  ;;  %1536 = vmatmul.msk.f32.gmra.mxu2 %vm364_vm3, %v659_v7 }
  0x74   : > { %1541 = vmatmul.msk.f32.gmra.mxu3 %vm364_vm3, %v659_v7 }
  0x7a   : > { %1543 = vmatmul.msk.f32.vlgmr.msrb.gmra.mxu0 %vm364_vm3, %v897_v22 }
  0x7b   : > { %1548 = vmatmul.msk.f32.vlgmr.msrb.gmra.mxu1 %vm364_vm3, %v897_v22  ;;  %1553 = vmatmul.msk.f32.vlgmr.msrb.gmra.mxu2 %vm364_vm3, %v897_v22 }
  0x7c   : > { %1558 = vmatmul.msk.f32.vlgmr.msrb.gmra.mxu3 %vm364_vm3, %v897_v22 }
  0x82   : > { %1544 = vmatmul.msk.f32.gmra.mxu0 %vm364_vm3, %v899_v26 }
  0x83   : > { %1549 = vmatmul.msk.f32.gmra.mxu1 %vm364_vm3, %v899_v26  ;;  %1554 = vmatmul.msk.f32.gmra.mxu2 %vm364_vm3, %v899_v26 }
  0x84   : > { %1559 = vmatmul.msk.f32.gmra.mxu3 %vm364_vm3, %v899_v26 }
  0x8a   : > { %1545 = vmatmul.msk.f32.gmra.mxu0 %vm364_vm3, %v901_v28 }
  0x8b   : > { %1550 = vmatmul.msk.f32.gmra.mxu1 %vm364_vm3, %v901_v28  ;;  %1555 = vmatmul.msk.f32.gmra.mxu2 %vm364_vm3, %v901_v28 }
  0x8c   : > { %1560 = vmatmul.msk.f32.gmra.mxu3 %vm364_vm3, %v901_v28 }
  0x92   : > { %1546 = vmatmul.msk.f32.gmra.mxu0 %vm364_vm3, %v900_v27 }
  0x93   : > { %1551 = vmatmul.msk.f32.gmra.mxu1 %vm364_vm3, %v900_v27  ;;  %1556 = vmatmul.msk.f32.gmra.mxu2 %vm364_vm3, %v900_v27 }
  0x94   : > { %1561 = vmatmul.msk.f32.gmra.mxu3 %vm364_vm3, %v900_v27 }
  0x97   : > { %v399_v31 = vpop.f32.mrf.mxu0 }
  0x98   : > { %v428_v33 = vpop.f32.mrf.mxu1 }
  0x9a   : > { %1563 = vmatmul.msk.f32.vlgmr.msra.gmra.mxu0 %vm364_vm3, %v1125_v32 }
  0x9b   : > { %1568 = vmatmul.msk.f32.vlgmr.msra.gmra.mxu1 %vm364_vm3, %v1125_v32  ;;  %1573 = vmatmul.msk.f32.vlgmr.msra.gmra.mxu2 %vm364_vm3, %v1125_v32 }
  0x9c   : > { %1578 = vmatmul.msk.f32.vlgmr.msra.gmra.mxu3 %vm364_vm3, %v1125_v32 }
  0x9e   : > { %v457_v48 = vpop.f32.mrf.mxu2 }
  0x9f   : > { %v486_v35 = vpop.f32.mrf.mxu3  ;;  %v402_v49 = vpop.f32.mrf.mxu0 }
  0xa0   : > { %v431_v37 = vpop.f32.mrf.mxu1 }
  0xa2   : > { %1564 = vmatmul.msk.f32.gmra.mxu0 %vm364_vm3, %v1127_v36 }
  0xa3   : > { %1569 = vmatmul.msk.f32.gmra.mxu1 %vm364_vm3, %v1127_v36  ;;  %1574 = vmatmul.msk.f32.gmra.mxu2 %vm364_vm3, %v1127_v36 }
  0xa4   : > { %1579 = vmatmul.msk.f32.gmra.mxu3 %vm364_vm3, %v1127_v36 }
  0xa6   : > { %v460_v60 = vpop.f32.mrf.mxu2 }
  0xa7   : > { %v489_v39 = vpop.f32.mrf.mxu3  ;;  %v405_v40 = vpop.f32.mrf.mxu0 }
  0xa8   : > { %v434_v42 = vpop.f32.mrf.mxu1 }
  0xaa   : > { %1565 = vmatmul.msk.f32.gmra.mxu0 %vm364_vm3, %v1129_v41 }
  0xab   : > { %1570 = vmatmul.msk.f32.gmra.mxu1 %vm364_vm3, %v1129_v41  ;;  %1575 = vmatmul.msk.f32.gmra.mxu2 %vm364_vm3, %v1129_v41 }
  0xac   : > { %1580 = vmatmul.msk.f32.gmra.mxu3 %vm364_vm3, %v1129_v41 }
  0xae   : > { %v463_v45 = vpop.f32.mrf.mxu2 }
  0xaf   : > { %v492_v11 = vpop.f32.mrf.mxu3  ;;  %v408_v46 = vpop.f32.mrf.mxu0 }
  0xb0   : > { %v437_v50 = vpop.f32.mrf.mxu1 }
  0xb2   : > { %1566 = vmatmul.msk.f32.gmra.mxu0 %vm364_vm3, %v1131_v47 }
  0xb3   : > { %1571 = vmatmul.msk.f32.gmra.mxu1 %vm364_vm3, %v1131_v47  ;;  %1576 = vmatmul.msk.f32.gmra.mxu2 %vm364_vm3, %v1131_v47 }
  0xb4   : > { %1581 = vmatmul.msk.f32.gmra.mxu3 %vm364_vm3, %v1131_v47 }
  0xb6   : > { %v466_v51 = vpop.f32.mrf.mxu2 }
  0xb7   : > { %v495_v52 = vpop.f32.mrf.mxu3  ;;  %v535_v53 = vpop.f32.mrf.mxu0 }
  0xb8   : > { %v1914_v54 = vadd.f32 %v535_v53, %v399_v31  ;;  %v564_v55 = vpop.f32.mrf.mxu1 }
  0xb9   : > { %v1916_v56 = vadd.f32 %v564_v55, %v428_v33 }
  0xbe   : > { %v593_v57 = vpop.f32.mrf.mxu2 }
  0xbf   : > { %v1918_v58 = vadd.f32 %v593_v57, %v457_v48  ;;  %v622_v59 = vpop.f32.mrf.mxu3  ;;  %v538_v61 = vpop.f32.mrf.mxu0 }
  0xc0   : > { %v1920_v62 = vadd.f32 %v622_v59, %v486_v35  ;;  %v1922_v63 = vadd.f32 %v538_v61, %v402_v49  ;;  %v567_v0 = vpop.f32.mrf.mxu1  ;;  %v1352_v49 = vld [vmem:[%s2132_s4] sm:$0xf] }
  0xc1   : > { %v1924_v1 = vadd.f32 %v567_v0, %v431_v37  ;;  %v1284_v0 = vld [vmem:[%s2130_s2] sm:$0xf] }
  0xc6   : > { %v596_v2 = vpop.f32.mrf.mxu2 }
  0xc7   : > { %v1926_v3 = vadd.f32 %v596_v2, %v460_v60  ;;  %v625_v4 = vpop.f32.mrf.mxu3  ;;  %v541_v5 = vpop.f32.mrf.mxu0 }
  0xc8   : > { %v1928_v6 = vadd.f32 %v625_v4, %v489_v39  ;;  %v1930_v7 = vadd.f32 %v541_v5, %v405_v40  ;;  %v570_v8 = vpop.f32.mrf.mxu1  ;;  %v1353_v39 = vadd.f32 1e-05, %v1352_v49  ;;  %v1999_v49 = vperm.slane %v1284_v0, 1 }
  0xc9   : > { %v1932_v9 = vadd.f32 %v570_v8, %v434_v42 }
  0xca   : > { %1607 = vrsqrt.f32 %v1353_v39  ;;  %vm1360_vm6 = vweird.f32 %v1353_v39 }
  0xce   : > { %v599_v10 = vpop.f32.mrf.mxu2 }
  0xcf   : > { %v1934_v12 = vadd.f32 %v599_v10, %v463_v45  ;;  %v628_v13 = vpop.f32.mrf.mxu3  ;;  %v544_v14 = vpop.f32.mrf.mxu0 }
  0xd0   : > { %v1936_v15 = vadd.f32 %v628_v13, %v492_v11  ;;  %v1938_v16 = vadd.f32 %v544_v14, %v408_v46  ;;  %v573_v17 = vpop.f32.mrf.mxu1  ;;  %v1608_v44 = vpop.eup %1607  ;;  %v1992_v13 = vperm.slane %v1284_v0, 0 }
  0xd1   : > { %v1940_v18 = vadd.f32 %v573_v17, %v437_v50  ;;  %v1355_v45 = vmul.f32 %v1608_v44, %v1353_v39  ;;  %vm1361_vm7 = vweird.f32 %v1608_v44 }
  0xd2   : > { %vm1362_vm8 = vmor %vm1360_vm6, %vm1361_vm7 }
  0xd6   : > { %v602_v19 = vpop.f32.mrf.mxu2 }
  0xd7   : > { %v1942_v20 = vadd.f32 %v602_v19, %v466_v51  ;;  %v631_v21 = vpop.f32.mrf.mxu3  ;;  %v763_v22 = vpop.f32.mrf.mxu0  ;;  %v1356_v51 = vmul.f32 %v1608_v44, %v1355_v45 }
  0xd8   : > { %v1944_v23 = vadd.f32 %v631_v21, %v495_v52  ;;  %v792_v24 = vpop.f32.mrf.mxu1  ;;  %v862_v2 = vadd.f32 %v763_v22, %v1914_v54  ;;  %v1326_v21 = vld [vmem:[%s2131_s3] sm:$0xf] }
  0xd9   : > { %v1357_v52 = vmul.f32 0.5, %v1356_v51  ;;  %v863_v4 = vadd.f32 %v792_v24, %v1916_v56  ;;  %v2002_v39 = vperm.slane %v1326_v21, 0 }
  0xdb   : > { %v1358_v61 = vsub.f32 1.5, %v1357_v52  ;;  %v2007_v52 = vperm.slane %v1326_v21, 1 }
  0xdd   : > { %v1359_v5 = vmul.f32 %v1608_v44, %v1358_v61 }
  0xde   : > { %v821_v25 = vpop.f32.mrf.mxu2 }
  0xdf   : > { %v850_v26 = vpop.f32.mrf.mxu3  ;;  %v766_v27 = vpop.f32.mrf.mxu0  ;;  %v1363_v22 = vsel %vm1362_vm8, %v1608_v44, %v1359_v5  ;;  %v864_v45 = vadd.f32 %v821_v25, %v1918_v58 }
  0xe0   : > { %v795_v28 = vpop.f32.mrf.mxu1  ;;  %v866_v61 = vadd.f32 %v766_v27, %v1922_v63  ;;  %v2012_v44 = vperm.slane %v1363_v22, 0 }
  0xe6   : > { %v1946_v29 = vpop.f32.mrf.mxu2 }
  0xe7   : > { %v1948_v30 = vpop.f32.mrf.mxu3  ;;  %v1950_v31 = vpop.f32.mrf.mxu0 }
  0xe8   : > { %v1952_v32 = vpop.f32.mrf.mxu1 }
  0xee   : > { %v1954_v33 = vpop.f32.mrf.mxu2 }
  0xef   : > { %v1956_v34 = vpop.f32.mrf.mxu3  ;;  %v1958_v48 = vpop.f32.mrf.mxu0 }
  0xf0   : > { %v1960_v35 = vpop.f32.mrf.mxu1 }
  0xf6   : > { %v1965_v36 = vpop.f32.mrf.mxu2 }
  0xf7   : > { %v1967_v37 = vpop.f32.mrf.mxu3  ;;  %v991_v38 = vpop.f32.mrf.mxu0 }
  0xf8   : > { %v1020_v60 = vpop.f32.mrf.mxu1  ;;  %v1090_v8 = vadd.f32 %v991_v38, %v862_v2  ;;  %v867_v2 = vadd.f32 %v795_v28, %v1924_v1 }
  0xf9   : > { %v1091_v14 = vadd.f32 %v1020_v60, %v863_v4  ;;  %v865_v60 = vadd.f32 %v850_v26, %v1920_v62 }
  0xfe   : > { %v1049_v40 = vpop.f32.mrf.mxu2 }
  0xff   : > { %v1078_v41 = vpop.f32.mrf.mxu3  ;;  %v994_v42 = vpop.f32.mrf.mxu0  ;;  %v1092_v5 = vadd.f32 %v1049_v40, %v864_v45  ;;  %v2030_v45 = vperm.slane %v1326_v21, 2 }
 0x100   : > { %v1023_v43 = vpop.f32.mrf.mxu1  ;;  %v1093_v58 = vadd.f32 %v1078_v41, %v865_v60  ;;  %v1094_v62 = vadd.f32 %v994_v42, %v866_v61  ;;  %v2036_v61 = vperm.slane %v1326_v21, 3  ;;  %v871_v21 = vadd.f32 %v1952_v32, %v1932_v9 }
 0x101   : > { %v1095_v63 = vadd.f32 %v1023_v43, %v867_v2  ;;  %v868_v43 = vadd.f32 %v1946_v29, %v1926_v3  ;;  %v2047_v29 = vperm.slane %v1363_v22, 3 }
 0x106   : > { %v1969_v11 = vpop.f32.mrf.mxu2 }
 0x107   : > { %v1971_v46 = vpop.f32.mrf.mxu3  ;;  %v1973_v47 = vpop.f32.mrf.mxu0 }
 0x108   : > { %v1975_v50 = vpop.f32.mrf.mxu1 }
 0x10e   : > { %v1977_v53 = vpop.f32.mrf.mxu2 }
 0x10f   : > { %v1979_v55 = vpop.f32.mrf.mxu3  ;;  %v1981_v57 = vpop.f32.mrf.mxu0 }
 0x110   : > { %v1983_v59 = vpop.f32.mrf.mxu1 }
 0x116   : > { %v1990_v10 = vpop.f32.mrf.mxu2 }
 0x117   : > { %v1994_v17 = vpop.f32.mrf.mxu3  ;;  %v1169_v19 = vpop.f32.mrf.mxu0 }
 0x118   : > { %v1268_v54 = vadd.f32 %v1169_v19, %v1090_v8  ;;  %v1198_v56 = vpop.f32.mrf.mxu1  ;;  %v2016_v19 = vperm.slane %v1284_v0, 2 }
 0x119   : > { %v1269_v24 = vadd.f32 %v1198_v56, %v1091_v14  ;;  %v2014_v14 = vperm.slane %v1363_v22, 1 }
 0x11a   : > { %v1294_v38 = vadd.f32 %v1992_v13, %v1268_v54  ;;  %v2019_v54 = vperm.slane %v1284_v0, 3 }
 0x11b   : > { %v1295_v51 = vadd.f32 %v1999_v49, %v1269_v24 }
 0x11c   : > { %v1310_v4 = vmax.f32 %v1294_v38, 0.0 }
 0x11d   : > { %v1311_v8 = vmax.f32 %v1295_v51, 0.0 }
 0x11e   : > { %v1336_v25 = vsub.f32 %v1310_v4, %v2002_v39  ;;  %v1227_v26 = vpop.f32.mrf.mxu2  ;;  %v869_v4 = vadd.f32 %v1948_v30, %v1928_v6 }
 0x11f   : > { %v1337_v1 = vsub.f32 %v1311_v8, %v2007_v52  ;;  %v1270_v27 = vadd.f32 %v1227_v26, %v1092_v5  ;;  %v1256_v28 = vpop.f32.mrf.mxu3  ;;  %v1172_v40 = vpop.f32.mrf.mxu0  ;;  %v2042_v8 = vperm.slane %v1363_v22, 2  ;;  %v1096_v26 = vadd.f32 %v1969_v11, %v868_v43 }
 0x120   : > { %v1373_v41 = vmul.f32 %v2012_v44, %v1336_v25  ;;  %v1271_v42 = vadd.f32 %v1256_v28, %v1093_v58  ;;  %v1272_v56 = vadd.f32 %v1172_v40, %v1094_v62  ;;  %v1201_v24 = vpop.f32.mrf.mxu1  ;;  %v870_v62 = vadd.f32 %v1950_v31, %v1930_v7 }
 0x121   : > { %v1374_v0 = vmul.f32 %v2014_v14, %v1337_v1  ;;  %v1296_v38 = vadd.f32 %v2016_v19, %v1270_v27  ;;  %v1273_v60 = vadd.f32 %v1201_v24, %v1095_v63  ;;  %v1097_v63 = vadd.f32 %v1971_v46, %v869_v4 }
 0x122   : > { %1389 = vst [vmem:[%s2024_s15] sm:$0xff] %v1373_v41  ;;  %v1297_v51 = vadd.f32 %v2019_v54, %v1271_v42  ;;  %v1298_v2 = vadd.f32 %v1992_v13, %v1272_v56  ;;  %v1098_v1 = vadd.f32 %v1973_v47, %v870_v62  ;;  %v1099_v22 = vadd.f32 %v1975_v50, %v871_v21 }
 0x123   : > { %1390 = vst [vmem:[%s2024_s15 + $0x8] sm:$0xff] %v1374_v0  ;;  %v1312_v5 = vmax.f32 %v1296_v38, 0.0  ;;  %v1299_v58 = vadd.f32 %v1999_v49, %v1273_v60  ;;  %v872_v43 = vadd.f32 %v1954_v33, %v1934_v12  ;;  %v873_v4 = vadd.f32 %v1956_v34, %v1936_v15 }
 0x124   : > { %v1313_v3 = vmax.f32 %v1297_v51, 0.0  ;;  %v1314_v25 = vmax.f32 %v1298_v2, 0.0 }
 0x125   : > { %v1338_v6 = vsub.f32 %v1312_v5, %v2030_v45  ;;  %v1315_v30 = vmax.f32 %v1299_v58, 0.0  ;;  %v874_v5 = vadd.f32 %v1958_v48, %v1938_v16  ;;  %v1101_v21 = vadd.f32 %v1979_v55, %v873_v4 }
 0x126   : > { %v1339_v27 = vsub.f32 %v1313_v3, %v2036_v61  ;;  %v1340_v7 = vsub.f32 %v1314_v25, %v2002_v39  ;;  %v1230_v31 = vpop.f32.mrf.mxu2  ;;  %v875_v3 = vadd.f32 %v1960_v35, %v1940_v18  ;;  %v1100_v25 = vadd.f32 %v1977_v53, %v872_v43 }
 0x127   : > { %v1375_v9 = vmul.f32 %v2042_v8, %v1338_v6  ;;  %v1341_v32 = vsub.f32 %v1315_v30, %v2007_v52  ;;  %v1274_v11 = vadd.f32 %v1230_v31, %v1096_v26  ;;  %v1259_v28 = vpop.f32.mrf.mxu3  ;;  %v1175_v40 = vpop.f32.mrf.mxu0  ;;  %v1102_v26 = vadd.f32 %v1981_v57, %v874_v5 }
 0x128   : > { %v1376_v46 = vmul.f32 %v2047_v29, %v1339_v27  ;;  %v1377_v47 = vmul.f32 %v2012_v44, %v1340_v7  ;;  %v1275_v41 = vadd.f32 %v1259_v28, %v1097_v63  ;;  %v1276_v42 = vadd.f32 %v1175_v40, %v1098_v1  ;;  %v1204_v56 = vpop.f32.mrf.mxu1 }
 0x129   : > { %1391 = vst [vmem:[%s2024_s15 + $0x10] sm:$0xff] %v1375_v9  ;;  %v1378_v24 = vmul.f32 %v2014_v14, %v1341_v32  ;;  %v1300_v50 = vadd.f32 %v2016_v19, %v1274_v11  ;;  %v1277_v0 = vadd.f32 %v1204_v56, %v1099_v22  ;;  %v1103_v48 = vadd.f32 %v1983_v59, %v875_v3 }
 0x12a   : > { %1392 = vst [vmem:[%s2024_s15 + $0x18] sm:$0xff] %v1376_v46  ;;  %v1301_v38 = vadd.f32 %v2019_v54, %v1275_v41  ;;  %v1302_v60 = vadd.f32 %v1992_v13, %v1276_v42  ;;  %v876_v32 = vadd.f32 %v1965_v36, %v1942_v20  ;;  %v877_v40 = vadd.f32 %v1967_v37, %v1944_v23 }
 0x12b   : > { %1393 = vst [vmem:[%s2024_s15 + $0x20] sm:$0xff] %v1377_v47  ;;  %v1316_v51 = vmax.f32 %v1300_v50, 0.0  ;;  %v1303_v2 = vadd.f32 %v1999_v49, %v1277_v0 }
 0x12c   : > { %1394 = vst [vmem:[%s2024_s15 + $0x28] sm:$0xff] %v1378_v24  ;;  %v1317_v58 = vmax.f32 %v1301_v38, 0.0  ;;  %v1318_v62 = vmax.f32 %v1302_v60, 0.0  ;;  %v1104_v41 = vadd.f32 %v1990_v10, %v876_v32  ;;  %v1105_v56 = vadd.f32 %v1994_v17, %v877_v40 }
 0x12d   : > { %v1342_v12 = vsub.f32 %v1316_v51, %v2030_v45  ;;  %v1319_v33 = vmax.f32 %v1303_v2, 0.0 }
 0x12e   : > { %v1343_v15 = vsub.f32 %v1317_v58, %v2036_v61  ;;  %v1344_v16 = vsub.f32 %v1318_v62, %v2002_v39  ;;  %v1233_v34 = vpop.f32.mrf.mxu2 }
 0x12f   : > { %v1379_v18 = vmul.f32 %v2042_v8, %v1342_v12  ;;  %v1345_v35 = vsub.f32 %v1319_v33, %v2007_v52  ;;  %v1278_v53 = vadd.f32 %v1233_v34, %v1100_v25  ;;  %v1262_v6 = vpop.f32.mrf.mxu3  ;;  %v1178_v30 = vpop.f32.mrf.mxu0 }
 0x130   : > { %v1380_v55 = vmul.f32 %v2047_v29, %v1343_v15  ;;  %v1381_v57 = vmul.f32 %v2012_v44, %v1344_v16  ;;  %v1279_v63 = vadd.f32 %v1262_v6, %v1101_v21  ;;  %v1280_v1 = vadd.f32 %v1178_v30, %v1102_v26  ;;  %v1207_v27 = vpop.f32.mrf.mxu1 }
 0x131   : > { %1395 = vst [vmem:[%s2024_s15 + $0x30] sm:$0xff] %v1379_v18  ;;  %v1382_v7 = vmul.f32 %v2014_v14, %v1345_v35  ;;  %v1304_v59 = vadd.f32 %v2016_v19, %v1278_v53  ;;  %v1281_v31 = vadd.f32 %v1207_v27, %v1103_v48 }
 0x132   : > { %1396 = vst [vmem:[%s2024_s15 + $0x38] sm:$0xff] %v1380_v55  ;;  %v1305_v22 = vadd.f32 %v2019_v54, %v1279_v63  ;;  %v1306_v9 = vadd.f32 %v1992_v13, %v1280_v1 }
 0x133   : > { %1397 = vst [vmem:[%s2024_s15 + $0x40] sm:$0xff] %v1381_v57  ;;  %v1320_v11 = vmax.f32 %v1304_v59, 0.0  ;;  %v1307_v28 = vadd.f32 %v1999_v49, %v1281_v31 }
 0x134   : > { %1398 = vst [vmem:[%s2024_s15 + $0x48] sm:$0xff] %v1382_v7  ;;  %v1321_v46 = vmax.f32 %v1305_v22, 0.0  ;;  %v1322_v47 = vmax.f32 %v1306_v9, 0.0 }
 0x135   : > { %v1346_v42 = vsub.f32 %v1320_v11, %v2030_v45  ;;  %v1323_v13 = vmax.f32 %v1307_v28, 0.0 }
 0x136   : > { %v1347_v20 = vsub.f32 %v1321_v46, %v2036_v61  ;;  %v1348_v36 = vsub.f32 %v1322_v47, %v2002_v39  ;;  %v1236_v49 = vpop.f32.mrf.mxu2 }
 0x137   : > { %v1383_v23 = vmul.f32 %v2042_v8, %v1346_v42  ;;  %v1349_v37 = vsub.f32 %v1323_v13, %v2007_v52  ;;  %v1282_v24 = vadd.f32 %v1236_v49, %v1104_v41  ;;  %v1265_v50 = vpop.f32.mrf.mxu3 }
 0x138   : > { %v1384_v10 = vmul.f32 %v2047_v29, %v1347_v20  ;;  %v1385_v0 = vmul.f32 %v2012_v44, %v1348_v36  ;;  %v1283_v17 = vadd.f32 %v1265_v50, %v1105_v56 }
 0x139   : > { %1399 = vst [vmem:[%s2024_s15 + $0x50] sm:$0xff] %v1383_v23  ;;  %v1386_v38 = vmul.f32 %v2014_v14, %v1349_v37  ;;  %v1308_v39 = vadd.f32 %v2016_v19, %v1282_v24 }
 0x13a   : > { %1400 = vst [vmem:[%s2024_s15 + $0x58] sm:$0xff] %v1384_v10  ;;  %v1309_v60 = vadd.f32 %v2019_v54, %v1283_v17 }
 0x13b   : > { %1401 = vst [vmem:[%s2024_s15 + $0x60] sm:$0x1f] %v1385_v0  ;;  %v1324_v43 = vmax.f32 %v1308_v39, 0.0 }
 0x13c   : > { %1402 = vst [vmem:[%s2024_s15 + $0x68] sm:$0x1f] %v1386_v38  ;;  %v1325_v52 = vmax.f32 %v1309_v60, 0.0 }
 0x13d   : > { %v1350_v51 = vsub.f32 %v1324_v43, %v2030_v45 }
 0x13e   : > { %v1351_v2 = vsub.f32 %v1325_v52, %v2036_v61 }
 0x13f   : > { %v1387_v44 = vmul.f32 %v2042_v8, %v1350_v51 }
 0x140   : > { %v1388_v4 = vmul.f32 %v2047_v29, %v1351_v2 }
 0x141   : > { %1403 = vst [vmem:[%s2024_s15 + $0x70] sm:$0x1f] %v1387_v44 }
 0x142   : > { %1404 = vst [vmem:[%s2024_s15 + $0x78] sm:$0x1f] %v1388_v4 }
 0x143 PF: > { %s16_s18 = sadd.s32 1, %s1649_s18  }
 0x144   : > { %p13_p7 = scmp.ge.s32.totalorder %s16_s18, 6  }
 0x146   :  { %15 = sbr.rel (!%p13_p7) target bundleno = 1 (0x1), region = 75 }
 0x14b   :  { %1426 = vsyncpa [#allocation3], 1 }
 0x14c   :  { %1428 = vsyncpa [#allocation3 + $0x1], 1 }

</bundles_post_ra>
